<compile_context>
chip_gen: v7x
topology: tpu7x:2x2x1
jax: 0.10.0
libtpu: 0.0.40
codegen_flags: <defaults>
</compile_context>

<pallas_src>
from functools import partial

import numpy as np
import jax
import jax.numpy as jnp
from jax import lax
from jax.experimental import pallas as pl
from jax.experimental.pallas import tpu as pltpu


_CONV_CFG = [
    # (in_ch, out_ch, k, stride, pad)
    (1, 8, 5, 2, 2),
    (8, 16, 3, 2, 1),
    (16, 32, 3, 2, 1),
    (32, 64, 3, 2, 1),
]
_BN_EPS = 1e-5
_LANE = 128


def _round_up(n, m):
    return ((n + m - 1) // m) * m


def _choose_batch_tile(n):
    """Batch tile (MXU M dim).

    Large (up to 256, MXU-width aligned for v6e/v7x) so matmul rows are not starved and
    per-grid-step overhead is amortized, but split into >=2 grid steps when the batch is
    big enough so both v7x TensorCores get work ("parallel" grid axis).  Tiny batches
    keep a single small tile -- padding 2 rows up to 256 would be pure wasted compute.
    """
    n8 = _round_up(max(n, 1), 8)
    if n8 <= 16:
        return n8                              # one tiny tile; splitting is pure overhead
    if n8 <= 512:
        return _round_up((n8 + 1) // 2, 8)     # exactly 2 tiles -> both v7x TCs busy
    return 256                                 # many full 256-row tiles


# ------------------------- Pallas kernel (whole network) -------------------------

def _fused_kernel(x_ref,
                  k1_ref, b1_ref, k2_ref, b2_ref,
                  k3_ref, b3_ref, k4_ref, b4_ref,
                  head_ref, fcb_ref, o_ref):
    """Whole network on one (TB, H*W*C) batch tile; intermediates never leave VMEM/vregs.

    x_ref : (TB, H*W*C) bf16  flattened NHWC input tile (cast wrapper-side)
    K/b   : dense BN-folded per-layer weight matrices (bf16) / biases (f32)
    head  : (1, 128) f32      avg-pool + Linear(64,1) folded, zero-padded 64 -> 128 lanes
    o_ref : (TB, 1)  f32      per-sample logit
    """
    # Layer 1: conv1(+BN1 scale) as one MXU matmul, f32 accumulation, fused bias + ReLU.
    y = jnp.maximum(
        jnp.dot(x_ref[...], k1_ref[...], preferred_element_type=jnp.float32)
        + b1_ref[...], 0.0)
    # Layers 2-4 (layer 4's output is zero-padded to 128 lanes -> fully lane-dense).
    for k_ref, b_ref in ((k2_ref, b2_ref), (k3_ref, b3_ref), (k4_ref, b4_ref)):
        y = jnp.maximum(
            jnp.dot(y.astype(jnp.bfloat16), k_ref[...],
                    preferred_element_type=jnp.float32)
            + b_ref[...], 0.0)
    # AdaptiveAvgPool2d(1) + Linear(64,1) folded into one per-lane weight vector:
    # VPU multiply + lane reduce (no degenerate (64,1) MXU matmul).  Elementwise work
    # stays f32 (v5e VPU has no bf16 path).  Output block is (TB, 1): no lane broadcast,
    # HBM writeback is exactly the (N, 1) result.
    o_ref[...] = jnp.sum(y * head_ref[...], axis=-1, keepdims=True) + fcb_ref[...]


# ------------------------- Wrapper-side parameter folding (cached) -------------------------

def _conv_as_dense(w_oikk, scale, H, W, stride, pad):
    """Fold a (BN-scaled) Conv2d into a dense matrix K with
       y_flat = x_flat @ K,
       x_flat index = (h*W + w)*IC + c   (NHWC flatten per sample),
       y     index = (oh*OW + ow)*OC + o."""
    w = np.asarray(w_oikk, np.float32) * np.asarray(scale, np.float32)[:, None, None, None]
    OC, IC, KH, KW = w.shape
    OH = (H + 2 * pad - KH) // stride + 1
    OW = (W + 2 * pad - KW) // stride + 1
    K = np.zeros((H * W * IC, OH * OW * OC), np.float32)
    for oh in range(OH):
        for ow in range(OW):
            col = (oh * OW + ow) * OC
            for kh in range(KH):
                h = oh * stride + kh - pad
                if not (0 <= h < H):
                    continue
                for kw in range(KW):
                    ww = ow * stride + kw - pad
                    if not (0 <= ww < W):
                        continue
                    row = (h * W + ww) * IC
                    K[row:row + IC, col:col + OC] = w[:, :, kh, kw].T
    return K, OH, OW


def fold_params(params, H, W):
    """One-time, host-side folding of conv + eval-mode BN + bias into dense bf16 matmuls.
    Heavy (python loops + H2D uploads) -> cached by _get_folded, never on the hot path."""
    Ks, bs = [], []
    h, w = H, W
    carry_shift = None                      # previous layer's post-ReLU BN shift, flattened
    for li, (_ic, _oc, _kk, stride, pad) in enumerate(_CONV_CFG, start=1):
        gamma = np.asarray(params[f"bn{li}_gamma"], np.float32)
        beta = np.asarray(params[f"bn{li}_beta"], np.float32)
        mean = np.asarray(params[f"bn{li}_mean"], np.float32)
        var = np.asarray(params[f"bn{li}_var"], np.float32)
        scale = gamma / np.sqrt(var + _BN_EPS)
        # ReLU(scale*x) = scale*ReLU(x) needs scale > 0; guard against trained gamma <= 0.
        assert np.all(scale > 0), "BN fold assumes gamma > 0 (scale > 0); fold is invalid."
        shift = beta - mean * scale

        K, oh, ow = _conv_as_dense(params[f"conv{li}_w"], scale, h, w, stride, pad)
        b = np.tile(np.asarray(params[f"conv{li}_b"], np.float32) * scale, oh * ow)
        shift_flat = np.tile(shift, oh * ow)

        # Zero-pad the output (lane) dim to a multiple of 128 (only layer 4: 64 -> 128)
        # so every matmul / bias / ReLU / head reduce is lane-dense.
        n_out = K.shape[1]
        n_pad = _round_up(n_out, _LANE)
        if n_pad != n_out:
            K = np.pad(K, ((0, 0), (0, n_pad - n_out)))
            b = np.pad(b, (0, n_pad - n_out))
            shift_flat = np.pad(shift_flat, (0, n_pad - n_out))

        K_bf16 = jnp.asarray(K, jnp.bfloat16)               # MXU operand
        K_rounded = np.asarray(K_bf16.astype(jnp.float32))  # what the kernel really multiplies
        if carry_shift is not None:
            # Fold the previous layer's post-ReLU BN shift into this layer's bias, using
            # the bf16-rounded K so the folded term matches the kernel's arithmetic.
            b = b + carry_shift @ K_rounded
        carry_shift = shift_flat

        Ks.append(K_bf16)
        bs.append(jnp.asarray(b.reshape(1, -1), jnp.float32))
        h, w = oh, ow

    # Head: AdaptiveAvgPool2d(1) + Linear(64, 1) -> single per-lane weight vector.
    s_out = h * w
    fc_w = np.asarray(params["fc_w"], np.float32).reshape(-1)          # (64,)
    head = np.tile(fc_w, s_out) / float(s_out)                         # avg-pool folded in
    head = np.pad(head, (0, carry_shift.shape[0] - head.shape[0]))     # match padded lanes
    fcb = float(np.asarray(params["fc_b"], np.float32).reshape(())) + float(carry_shift @ head)
    return (tuple(Ks), tuple(bs),
            jnp.asarray(head.reshape(1, -1), jnp.float32),
            jnp.asarray([[fcb]], jnp.float32))


_FOLD_CACHE = {}


def _get_folded(params, H, W):
    # Cache keyed on the params object (assumed not mutated in place after first use).
    key = (id(params), H, W)
    if key not in _FOLD_CACHE:
        _FOLD_CACHE[key] = fold_params(params, H, W)
    return _FOLD_CACHE[key]


# ------------------------- Forward pass -------------------------

@partial(jax.jit, static_argnums=(0,))
def _fused_forward(tb, x_pad, k1, b1, k2, b2, k3, b3, k4, b4, head, fcb):
    m_pad, feat = x_pad.shape

    def resident(a):
        # Full-array block with a constant index_map: the block index never changes
        # across grid steps, so Pallas DMAs it once and keeps it resident in VMEM
        # (~0.6 MiB of bf16 weights total) -- no per-step re-fetch.
        return pl.BlockSpec(a.shape, lambda i: (0, 0))

    return pl.pallas_call(
        _fused_kernel,
        out_shape=jax.ShapeDtypeStruct((m_pad, 1), jnp.float32),
        grid=(m_pad // tb,),
        in_specs=[
            pl.BlockSpec((tb, feat), lambda i: (i, 0)),   # the only per-step DMA stream (bf16)
            resident(k1), resident(b1), resident(k2), resident(b2),
            resident(k3), resident(b3), resident(k4), resident(b4),
            resident(head), resident(fcb),
        ],
        out_specs=pl.BlockSpec((tb, 1), lambda i: (i, 0)),
        compiler_params=pltpu.CompilerParams(
            dimension_semantics=("parallel",)),           # batch tiles split across v7x's 2 TCs
    )(x_pad, k1, b1, k2, b2, k3, b3, k4, b4, head, fcb)


def audio_classifier_forward(params, x_nchw):
    N, C, H, W = x_nchw.shape
    Ks, bs, head, fcb = _get_folded(params, H, W)        # host-side fold: cached, runs once

    # NCHW -> NHWC -> per-sample flatten ((h*W + w)*C + c); cast to bf16 wrapper-side
    # (halves the only per-tile input DMA); pad batch rows to a multiple of the tile.
    x = jnp.transpose(x_nchw, (0, 2, 3, 1)).reshape(N, H * W * C).astype(jnp.bfloat16)
    tb = _choose_batch_tile(N)
    m_pad = _round_up(N, tb)
    x = jnp.pad(x, ((0, m_pad - N), (0, 0)))

    out = _fused_forward(tb, x, Ks[0], bs[0], Ks[1], bs[1],
                         Ks[2], bs[2], Ks[3], bs[3], head, fcb)
    return out[:N]                                        # (N, 1)


# ------------------------- Parameter setup & pure-JAX reference -------------------------

def init_params(key):
    params = {}
    for li, (ic, oc, k, _, _) in enumerate(_CONV_CFG, start=1):
        key, kw_, kb_ = jax.random.split(key, 3)
        params[f"conv{li}_w"] = 0.1 * jax.random.normal(kw_, (oc, ic, k, k), jnp.float32)
        params[f"conv{li}_b"] = 0.01 * jax.random.normal(kb_, (oc,), jnp.float32)
        # BatchNorm2d defaults: gamma=1, beta=0, running_mean=0, running_var=1
        params[f"bn{li}_gamma"] = jnp.ones((oc,), jnp.float32)
        params[f"bn{li}_beta"] = jnp.zeros((oc,), jnp.float32)
        params[f"bn{li}_mean"] = jnp.zeros((oc,), jnp.float32)
        params[f"bn{li}_var"] = jnp.ones((oc,), jnp.float32)
    key, kw_, kb_ = jax.random.split(key, 3)
    params["fc_w"] = 0.1 * jax.random.normal(kw_, (1, 64), jnp.float32)  # PyTorch (out, in)
    params["fc_b"] = 0.01 * jax.random.normal(kb_, (1,), jnp.float32)
    return params


def reference_forward(params, x_nchw):
    """Plain-JAX eval-mode reference (not on the kernel path; correctness check only)."""
    x = jnp.transpose(x_nchw, (0, 2, 3, 1)).astype(jnp.float32)      # NHWC
    for li, (ic, oc, k, stride, pad) in enumerate(_CONV_CFG, start=1):
        w = jnp.transpose(params[f"conv{li}_w"], (2, 3, 1, 0))       # HWIO
        x = lax.conv_general_dilated(
            x, w, (stride, stride), [(pad, pad), (pad, pad)],
            dimension_numbers=("NHWC", "HWIO", "NHWC"))
        x = jnp.maximum(x + params[f"conv{li}_b"], 0.0)
        scale = params[f"bn{li}_gamma"] / jnp.sqrt(params[f"bn{li}_var"] + _BN_EPS)
        shift = params[f"bn{li}_beta"] - params[f"bn{li}_mean"] * scale
        x = x * scale + shift
    pooled = jnp.mean(x, axis=(1, 2))                                # (N, 64)
    return pooled @ params["fc_w"].T + params["fc_b"]                # (N, 1)


# ------------------------- Main -------------------------

if __name__ == "__main__":
    key = jax.random.PRNGKey(0)
    k_param, k_input = jax.random.split(key)

    params = init_params(k_param)
    # Input consistent with Conv2d(1, ...) NCHW: batch=2, channels=1, 16x16 "spectrogram"
    x = jax.random.normal(k_input, (2, 1, 16, 16), jnp.float32)

    out = jax.block_until_ready(audio_classifier_forward(params, x))
    assert out.shape == (2, 1), out.shape
    assert bool(jnp.all(jnp.isfinite(out)))

    ref = reference_forward(params, x)
    assert bool(jnp.allclose(out, ref, rtol=5e-2, atol=5e-2)), (out, ref)

    # Second call: hits the fold cache + jit cache (no host-side refolding / re-upload).
    out2 = jax.block_until_ready(audio_classifier_forward(params, x))
    assert bool(jnp.allclose(out, out2))

    print("KERNEL_OK")
</pallas_src>

<mosaic_0001>
module attributes {stable_mosaic.version = 11 : i64} {
  func.func @_fused_kernel(%arg0: i32, %arg1: memref<8x256xbf16, #tpu.memory_space<vmem>>, %arg2: memref<256x512xbf16, #tpu.memory_space<vmem>>, %arg3: memref<1x512xf32, #tpu.memory_space<vmem>>, %arg4: memref<512x256xbf16, #tpu.memory_space<vmem>>, %arg5: memref<1x256xf32, #tpu.memory_space<vmem>>, %arg6: memref<256x128xbf16, #tpu.memory_space<vmem>>, %arg7: memref<1x128xf32, #tpu.memory_space<vmem>>, %arg8: memref<128x128xbf16, #tpu.memory_space<vmem>>, %arg9: memref<1x128xf32, #tpu.memory_space<vmem>>, %arg10: memref<1x128xf32, #tpu.memory_space<vmem>>, %arg11: memref<1x1xf32, #tpu.memory_space<vmem>>, %arg12: memref<8x1xf32, #tpu.memory_space<vmem>>) attributes {dimension_semantics = [#tpu.dimension_semantics<parallel>], iteration_bounds = array<i64: 1>, scalar_prefetch = 0 : i64, scratch_operands = 0 : i64, tpu.core_type = #tpu.core_type<tc>, window_params = [{transform_indices = @transform_0, window_bounds = array<i64: 8, 256>}, {pipeline_mode = #tpu.pipeline_mode<synchronous>, transform_indices = @transform_1, window_bounds = array<i64: 256, 512>}, {pipeline_mode = #tpu.pipeline_mode<synchronous>, transform_indices = @transform_2, window_bounds = array<i64: 1, 512>}, {pipeline_mode = #tpu.pipeline_mode<synchronous>, transform_indices = @transform_3, window_bounds = array<i64: 512, 256>}, {pipeline_mode = #tpu.pipeline_mode<synchronous>, transform_indices = @transform_4, window_bounds = array<i64: 1, 256>}, {pipeline_mode = #tpu.pipeline_mode<synchronous>, transform_indices = @transform_5, window_bounds = array<i64: 256, 128>}, {pipeline_mode = #tpu.pipeline_mode<synchronous>, transform_indices = @transform_6, window_bounds = array<i64: 1, 128>}, {pipeline_mode = #tpu.pipeline_mode<synchronous>, transform_indices = @transform_7, window_bounds = array<i64: 128, 128>}, {pipeline_mode = #tpu.pipeline_mode<synchronous>, transform_indices = @transform_8, window_bounds = array<i64: 1, 128>}, {pipeline_mode = #tpu.pipeline_mode<synchronous>, transform_indices = @transform_9, window_bounds = array<i64: 1, 128>}, {pipeline_mode = #tpu.pipeline_mode<synchronous>, transform_indices = @transform_10, window_bounds = array<i64: 1, 1>}, {transform_indices = @transform_11, window_bounds = array<i64: 8, 1>}]} {
    %c0 = arith.constant 0 : index
    %c0_0 = arith.constant 0 : index
    %0 = vector.load %arg1[%c0, %c0_0] : memref<8x256xbf16, #tpu.memory_space<vmem>>, vector<8x256xbf16>
    %c0_1 = arith.constant 0 : index
    %c0_2 = arith.constant 0 : index
    %1 = vector.load %arg2[%c0_1, %c0_2] : memref<256x512xbf16, #tpu.memory_space<vmem>>, vector<256x512xbf16>
    %cst = arith.constant dense<0.000000e+00> : vector<8x512xf32>
    %2 = tpu.matmul %0, %1, %cst {dimension_numbers = #tpu.dot_dimension_numbers<[1], [0], [0], [1], [0, 0, 1, 1], [], []>} : vector<8x256xbf16>, vector<256x512xbf16>, vector<8x512xf32> -> vector<8x512xf32>
    %c0_3 = arith.constant 0 : index
    %c0_4 = arith.constant 0 : index
    %3 = vector.load %arg3[%c0_3, %c0_4] : memref<1x512xf32, #tpu.memory_space<vmem>>, vector<1x512xf32>
    %4 = vector.broadcast %3 : vector<1x512xf32> to vector<8x512xf32>
    %5 = arith.addf %2, %4 : vector<8x512xf32>
    %cst_5 = arith.constant 0.000000e+00 : f32
    %6 = vector.broadcast %cst_5 : f32 to vector<8x512xf32>
    %7 = arith.maximumf %5, %6 : vector<8x512xf32>
    %8 = arith.truncf %7 : vector<8x512xf32> to vector<8x512xbf16>
    %c0_6 = arith.constant 0 : index
    %c0_7 = arith.constant 0 : index
    %9 = vector.load %arg4[%c0_6, %c0_7] : memref<512x256xbf16, #tpu.memory_space<vmem>>, vector<512x256xbf16>
    %cst_8 = arith.constant dense<0.000000e+00> : vector<8x256xf32>
    %10 = tpu.matmul %8, %9, %cst_8 {dimension_numbers = #tpu.dot_dimension_numbers<[1], [0], [0], [1], [0, 0, 1, 1], [], []>} : vector<8x512xbf16>, vector<512x256xbf16>, vector<8x256xf32> -> vector<8x256xf32>
    %c0_9 = arith.constant 0 : index
    %c0_10 = arith.constant 0 : index
    %11 = vector.load %arg5[%c0_9, %c0_10] : memref<1x256xf32, #tpu.memory_space<vmem>>, vector<1x256xf32>
    %12 = vector.broadcast %11 : vector<1x256xf32> to vector<8x256xf32>
    %13 = arith.addf %10, %12 : vector<8x256xf32>
    %cst_11 = arith.constant 0.000000e+00 : f32
    %14 = vector.broadcast %cst_11 : f32 to vector<8x256xf32>
    %15 = arith.maximumf %13, %14 : vector<8x256xf32>
    %16 = arith.truncf %15 : vector<8x256xf32> to vector<8x256xbf16>
    %c0_12 = arith.constant 0 : index
    %c0_13 = arith.constant 0 : index
    %17 = vector.load %arg6[%c0_12, %c0_13] : memref<256x128xbf16, #tpu.memory_space<vmem>>, vector<256x128xbf16>
    %cst_14 = arith.constant dense<0.000000e+00> : vector<8x128xf32>
    %18 = tpu.matmul %16, %17, %cst_14 {dimension_numbers = #tpu.dot_dimension_numbers<[1], [0], [0], [1], [0, 0, 1, 1], [], []>} : vector<8x256xbf16>, vector<256x128xbf16>, vector<8x128xf32> -> vector<8x128xf32>
    %c0_15 = arith.constant 0 : index
    %c0_16 = arith.constant 0 : index
    %19 = vector.load %arg7[%c0_15, %c0_16] : memref<1x128xf32, #tpu.memory_space<vmem>>, vector<1x128xf32>
    %20 = vector.broadcast %19 : vector<1x128xf32> to vector<8x128xf32>
    %21 = arith.addf %18, %20 : vector<8x128xf32>
    %cst_17 = arith.constant 0.000000e+00 : f32
    %22 = vector.broadcast %cst_17 : f32 to vector<8x128xf32>
    %23 = arith.maximumf %21, %22 : vector<8x128xf32>
    %24 = arith.truncf %23 : vector<8x128xf32> to vector<8x128xbf16>
    %c0_18 = arith.constant 0 : index
    %c0_19 = arith.constant 0 : index
    %25 = vector.load %arg8[%c0_18, %c0_19] : memref<128x128xbf16, #tpu.memory_space<vmem>>, vector<128x128xbf16>
    %cst_20 = arith.constant dense<0.000000e+00> : vector<8x128xf32>
    %26 = tpu.matmul %24, %25, %cst_20 {dimension_numbers = #tpu.dot_dimension_numbers<[1], [0], [0], [1], [0, 0, 1, 1], [], []>} : vector<8x128xbf16>, vector<128x128xbf16>, vector<8x128xf32> -> vector<8x128xf32>
    %c0_21 = arith.constant 0 : index
    %c0_22 = arith.constant 0 : index
    %27 = vector.load %arg9[%c0_21, %c0_22] : memref<1x128xf32, #tpu.memory_space<vmem>>, vector<1x128xf32>
    %28 = vector.broadcast %27 : vector<1x128xf32> to vector<8x128xf32>
    %29 = arith.addf %26, %28 : vector<8x128xf32>
    %cst_23 = arith.constant 0.000000e+00 : f32
    %30 = vector.broadcast %cst_23 : f32 to vector<8x128xf32>
    %31 = arith.maximumf %29, %30 : vector<8x128xf32>
    %c0_24 = arith.constant 0 : index
    %c0_25 = arith.constant 0 : index
    %32 = vector.load %arg10[%c0_24, %c0_25] : memref<1x128xf32, #tpu.memory_space<vmem>>, vector<1x128xf32>
    %33 = vector.broadcast %32 : vector<1x128xf32> to vector<8x128xf32>
    %34 = arith.mulf %31, %33 : vector<8x128xf32>
    %cst_26 = arith.constant dense<0.000000e+00> : vector<8xf32>
    %35 = vector.multi_reduction <add>, %34, %cst_26 [1] : vector<8x128xf32> to vector<8xf32>
    %36 = vector.shape_cast %35 : vector<8xf32> to vector<8x1xf32>
    %c0_27 = arith.constant 0 : index
    %c0_28 = arith.constant 0 : index
    %37 = vector.load %arg11[%c0_27, %c0_28] : memref<1x1xf32, #tpu.memory_space<vmem>>, vector<1x1xf32>
    %38 = vector.broadcast %37 : vector<1x1xf32> to vector<8x1xf32>
    %39 = arith.addf %36, %38 : vector<8x1xf32>
    %c0_29 = arith.constant 0 : index
    %c0_30 = arith.constant 0 : index
    %40 = vector.load %arg12[%c0_29, %c0_30] : memref<8x1xf32, #tpu.memory_space<vmem>>, vector<8x1xf32>
    tpu.vector_store %arg12[%c0_29, %c0_30], %39 {strides = array<i32>} : memref<8x1xf32, #tpu.memory_space<vmem>>, vector<8x1xf32>,
    return
  }
  func.func @transform_0(%arg0: i32) -> (i32, i32) {
    %c0_i32 = arith.constant 0 : i32
    %c0_i32_0 = arith.constant 0 : i32
    return %arg0, %c0_i32 : i32, i32
  }
  func.func @transform_1(%arg0: i32) -> (i32, i32) {
    %c0_i32 = arith.constant 0 : i32
    %c0_i32_0 = arith.constant 0 : i32
    %c0_i32_1 = arith.constant 0 : i32
    return %c0_i32, %c0_i32_0 : i32, i32
  }
  func.func @transform_2(%arg0: i32) -> (i32, i32) {
    %c0_i32 = arith.constant 0 : i32
    %c0_i32_0 = arith.constant 0 : i32
    %c0_i32_1 = arith.constant 0 : i32
    return %c0_i32, %c0_i32_0 : i32, i32
  }
  func.func @transform_3(%arg0: i32) -> (i32, i32) {
    %c0_i32 = arith.constant 0 : i32
    %c0_i32_0 = arith.constant 0 : i32
    %c0_i32_1 = arith.constant 0 : i32
    return %c0_i32, %c0_i32_0 : i32, i32
  }
  func.func @transform_4(%arg0: i32) -> (i32, i32) {
    %c0_i32 = arith.constant 0 : i32
    %c0_i32_0 = arith.constant 0 : i32
    %c0_i32_1 = arith.constant 0 : i32
    return %c0_i32, %c0_i32_0 : i32, i32
  }
  func.func @transform_5(%arg0: i32) -> (i32, i32) {
    %c0_i32 = arith.constant 0 : i32
    %c0_i32_0 = arith.constant 0 : i32
    %c0_i32_1 = arith.constant 0 : i32
    return %c0_i32, %c0_i32_0 : i32, i32
  }
  func.func @transform_6(%arg0: i32) -> (i32, i32) {
    %c0_i32 = arith.constant 0 : i32
    %c0_i32_0 = arith.constant 0 : i32
    %c0_i32_1 = arith.constant 0 : i32
    return %c0_i32, %c0_i32_0 : i32, i32
  }
  func.func @transform_7(%arg0: i32) -> (i32, i32) {
    %c0_i32 = arith.constant 0 : i32
    %c0_i32_0 = arith.constant 0 : i32
    %c0_i32_1 = arith.constant 0 : i32
    return %c0_i32, %c0_i32_0 : i32, i32
  }
  func.func @transform_8(%arg0: i32) -> (i32, i32) {
    %c0_i32 = arith.constant 0 : i32
    %c0_i32_0 = arith.constant 0 : i32
    %c0_i32_1 = arith.constant 0 : i32
    return %c0_i32, %c0_i32_0 : i32, i32
  }
  func.func @transform_9(%arg0: i32) -> (i32, i32) {
    %c0_i32 = arith.constant 0 : i32
    %c0_i32_0 = arith.constant 0 : i32
    %c0_i32_1 = arith.constant 0 : i32
    return %c0_i32, %c0_i32_0 : i32, i32
  }
  func.func @transform_10(%arg0: i32) -> (i32, i32) {
    %c0_i32 = arith.constant 0 : i32
    %c0_i32_0 = arith.constant 0 : i32
    %c0_i32_1 = arith.constant 0 : i32
    return %c0_i32, %c0_i32_0 : i32, i32
  }
  func.func @transform_11(%arg0: i32) -> (i32, i32) {
    %c0_i32 = arith.constant 0 : i32
    %c0_i32_0 = arith.constant 0 : i32
    return %arg0, %c0_i32 : i32, i32
  }
}

</mosaic_0001>

<bundles_post_ra>
// kernel: _fused_forward.1
= control target key start
LH: loop header
LB: loop body
LE: loop exit
PB: predicated region body
PF: predicated region fallthrough
CT: control target
= control target key end

     0   :  { %s2164_s0 = inlined_call_operand.hbm [shape: bf16[8,256], index: 0, kind: input, shape index: {}]   ;;  %s2165_s1 = inlined_call_operand.hbm [shape: bf16[256,512], index: 1, kind: input, shape index: {}]   ;;  %s2166_s2 = inlined_call_operand.vmem [shape: f32[1,512], index: 2, kind: input, shape index: {}]   ;;  %s2167_s3 = inlined_call_operand.hbm [shape: bf16[512,256], index: 3, kind: input, shape index: {}]   ;;  %s2168_s4 = inlined_call_operand.vmem [shape: f32[1,256], index: 4, kind: input, shape index: {}]   ;;  %s2169_s5 = inlined_call_operand.hbm [shape: bf16[256,128], index: 5, kind: input, shape index: {}]   ;;  %s2170_s6 = inlined_call_operand.vmem [shape: f32[1,128], index: 6, kind: input, shape index: {}]   ;;  %s2171_s7 = inlined_call_operand.hbm [shape: bf16[128,128], index: 7, kind: input, shape index: {}]   ;;  %s2172_s8 = inlined_call_operand.vmem [shape: f32[1,128], index: 8, kind: input, shape index: {}]   ;;  %s2173_s9 = inlined_call_operand.vmem [shape: f32[1,128], index: 9, kind: input, shape index: {}]   ;;  %s2174_s10 = inlined_call_operand.<no memory space> [shape: f32[1,1], index: 10, kind: input, shape index: {}]   ;;  %s2175_s11 = inlined_call_operand.vmem [shape: f32[8,1], index: 11, kind: output, shape index: {}]  }
   0x1   :  { %v16_v0 = vstv %s2174_s10 }
   0x2   :  { %17 = vst [vmem:[#allocation2] sm:$0x1] %v16_v0 }
   0x3   :  { %18 = vsyncpa [#allocation4], 0 }
   0x4   :  { %19 = vsyncpa [#allocation6], 0 }
   0x5   :  { %20 = vsyncpa [#allocation9], 0  ;;  %s1971_s19 = smov [#allocation5]   ;;  %s1855_s23 = scalar_lea.hbm %s2165_s1, 8192 }
   0x6   :  { %s36_s20 = sshll.u32 %s1971_s19, 4  ;;  %p1856_p0 = scmp.ne.s32.totalorder %s2165_s1, %s1855_s23  ;;  %s37_s20 = int_to_ptr.vmem [resolvable:$true] %s36_s20 }
   0x7   :  { %p1859_p1 = scmp.lt.u32.totalorder %s1855_s23, %s2165_s1 }
   0x9   :  { %p1861_p2 = pnand %p1859_p1, %p1856_p0 }
   0xb   :  { %1864 = shalt.err (!%p1861_p2)
}
   0xc   :  { %s1865_s10 = scalar_lea.vmem %s37_s20, 8192  ;;  %p1870_p4 = scmp.lt.s32.totalorder %s37_s20, %s37_s20 }
   0xd   :  { %p1866_p3 = scmp.ne.s32.totalorder %s37_s20, %s1865_s10  ;;  %p1871_p5 = scmp.lt.s32.totalorder %s1865_s10, %s1865_s10 }
   0xf   :  { %p1872_p6 = por %p1871_p5, %p1870_p4 }
  0x11   :  { %p1873_p7 = pnand %p1872_p6, %p1866_p3 }
  0x13   :  { %1876 = shalt.err (!%p1873_p7)
}
  0x14   :  { %s1972_s28 = smov 256   ;;  %s1973_s29 = smov 16  }
  0x15   :  { %42 = dma.hbm_to_vmem [thread:$0]  %s2165_s1, 8192, %s37_s20, [#allocation6], %s1972_s28, %s1972_s28, %s1973_s29  }
  0x16   :  { %s1974_s13 = smov [#allocation8]   ;;  %s1877_s17 = scalar_lea.hbm %s2169_s5, 2048 }
  0x17   :  { %s64_s14 = sshll.u32 %s1974_s13, 4  ;;  %p1878_p8 = scmp.ne.s32.totalorder %s2169_s5, %s1877_s17  ;;  %s65_s14 = int_to_ptr.vmem [resolvable:$true] %s64_s14 }
  0x18   :  { %p1881_p9 = scmp.lt.u32.totalorder %s1877_s17, %s2169_s5 }
  0x1a   :  { %p1883_p10 = pnand %p1881_p9, %p1878_p8 }
  0x1c   :  { %1886 = shalt.err (!%p1883_p10)
}
  0x1d   :  { %s1887_s23 = scalar_lea.vmem %s65_s14, 2048  ;;  %p1892_p12 = scmp.lt.s32.totalorder %s65_s14, %s65_s14 }
  0x1e   :  { %p1888_p11 = scmp.ne.s32.totalorder %s65_s14, %s1887_s23  ;;  %p1893_p13 = scmp.lt.s32.totalorder %s1887_s23, %s1887_s23 }
  0x20   :  { %p1894_p0 = por %p1893_p13, %p1892_p12 }
  0x22   :  { %p1895_p1 = pnand %p1894_p0, %p1888_p11 }
  0x24   :  { %1898 = shalt.err (!%p1895_p1)
}
  0x25   :  { %s1975_s1 = smov 64   ;;  %s1976_s20 = smov 4  }
  0x26   :  { %70 = dma.hbm_to_vmem [thread:$0]  %s2169_s5, 2048, %s65_s14, [#allocation9], %s1975_s1, %s1975_s1, %s1976_s20  }
  0x27   :  { %s1977_s26 = smov [#allocation3]   ;;  %s1978_s10 = smov [#allocation7]  }
  0x28   :  { %s27_s27 = sshll.u32 %s1977_s26, 4  ;;  %s50_s28 = sshll.u32 %s1978_s10, 4  ;;  %s28_s27 = int_to_ptr.vmem [resolvable:$true] %s27_s27  ;;  %s2074_s28 = int_to_ptr.vmem [resolvable:$true] %s50_s28 }
  0x29   :  { %s1899_s12 = scalar_lea.hbm %s2164_s0, 128 }
  0x2a   :  { %p1900_p2 = scmp.ne.s32.totalorder %s2164_s0, %s1899_s12  ;;  %p1903_p3 = scmp.lt.u32.totalorder %s1899_s12, %s2164_s0 }
  0x2c   :  { %p1905_p4 = pnand %p1903_p3, %p1900_p2 }
  0x2e   :  { %1908 = shalt.err (!%p1905_p4)
}
  0x2f   :  { %s1909_s5 = scalar_lea.vmem %s28_s27, 128  ;;  %p1914_p6 = scmp.lt.s32.totalorder %s28_s27, %s28_s27 }
  0x30   :  { %p1910_p5 = scmp.ne.s32.totalorder %s28_s27, %s1909_s5  ;;  %p1915_p7 = scmp.lt.s32.totalorder %s1909_s5, %s1909_s5 }
  0x32   :  { %p1916_p8 = por %p1915_p7, %p1914_p6 }
  0x34   :  { %p1917_p9 = pnand %p1916_p8, %p1910_p5 }
  0x36   :  { %1920 = shalt.err (!%p1917_p9)
}
  0x37   :  { %30 = dma.hbm_to_vmem [thread:$0]  %s2164_s0, 128, %s28_s27, [#allocation4]  }
  0x38   :  { %s1921_s22 = scalar_lea.hbm %s2167_s3, 8192 }
  0x39   :  { %p1922_p10 = scmp.ne.s32.totalorder %s2167_s3, %s1921_s22  ;;  %p1925_p11 = scmp.lt.u32.totalorder %s1921_s22, %s2167_s3 }
  0x3b   :  { %p1927_p12 = pnand %p1925_p11, %p1922_p10 }
  0x3d   :  { %1930 = shalt.err (!%p1927_p12)
}
  0x3e   :  { %s1931_s10 = scalar_lea.vmem %s2074_s28, 8192  ;;  %p1936_p0 = scmp.lt.s32.totalorder %s2074_s28, %s2074_s28 }
  0x3f   :  { %p1932_p13 = scmp.ne.s32.totalorder %s2074_s28, %s1931_s10  ;;  %p1937_p1 = scmp.lt.s32.totalorder %s1931_s10, %s1931_s10 }
  0x41   :  { %p1938_p2 = por %p1937_p1, %p1936_p0 }
  0x43   :  { %p1939_p3 = pnand %p1938_p2, %p1932_p13 }
  0x45   :  { %1942 = shalt.err (!%p1939_p3)
}
  0x46   :  { %s1979_s0 = smov 128   ;;  %s1980_s27 = smov 8  }
  0x47   :  { %56 = dma.hbm_to_vmem [thread:$0]  %s2167_s3, 8192, %s2074_s28, [#allocation6], %s1979_s0, %s1979_s0, %s1980_s27  }
  0x48   :  { %s1981_s12 = smov [#allocation10]   ;;  %s1943_s17 = scalar_lea.hbm %s2171_s7, 1024 }
  0x49   :  { %s78_s13 = sshll.u32 %s1981_s12, 4  ;;  %p1944_p4 = scmp.ne.s32.totalorder %s2171_s7, %s1943_s17  ;;  %s79_s13 = int_to_ptr.vmem [resolvable:$true] %s78_s13 }
  0x4a   :  { %p1947_p5 = scmp.lt.u32.totalorder %s1943_s17, %s2171_s7 }
  0x4c   :  { %p1949_p6 = pnand %p1947_p5, %p1944_p4 }
  0x4e   :  { %1952 = shalt.err (!%p1949_p6)
}
  0x4f   :  { %s1953_s21 = scalar_lea.vmem %s79_s13, 1024  ;;  %p1958_p8 = scmp.lt.s32.totalorder %s79_s13, %s79_s13 }
  0x50   :  { %p1954_p7 = scmp.ne.s32.totalorder %s79_s13, %s1953_s21  ;;  %p1959_p9 = scmp.lt.s32.totalorder %s1953_s21, %s1953_s21 }
  0x52   :  { %p1960_p10 = por %p1959_p9, %p1958_p8 }
  0x54   :  { %p1961_p11 = pnand %p1960_p10, %p1954_p7 }
  0x56   :  { %1964 = shalt.err (!%p1961_p11)
}
  0x57   :  { %84 = dma.hbm_to_vmem [thread:$0]  %s2171_s7, 1024, %s79_s13, [#allocation9], %s1975_s1, %s1975_s1, %s1976_s20  }
  0x58   :  { %1965 = dma.done.wait [#allocation4], 128  }
  0x59   :  { %1966 = vsyncadd [#allocation4], 4294967168 }
  0x5a   :  { %1967 = dma.done.wait [#allocation6], 16384  }
  0x5b   :  { %1968 = vsyncadd [#allocation6], 4294950912 }
  0x5c   :  { %1969 = dma.done.wait [#allocation9], 3072  }
  0x5d   :  { %1970 = vsyncadd [#allocation9], 4294964224  ;;  %v1637_v1 = vld [vmem:[#allocation5 + $0x4] ss:$16 sps:$4 sm:$0xff]   ;;  %v1639_v2 = vld [vmem:[#allocation5] ss:$16 sps:$4 sm:$0xff]  }
  0x5e   :  { %521 = vmatprep.subr.bf16.mxu0 %v1637_v1  ;;  %v1640_v3 = vld [vmem:[#allocation5 + $0x24] ss:$16 sps:$4 sm:$0xff]   ;;  %v1642_v4 = vld [vmem:[#allocation5 + $0x20] ss:$16 sps:$4 sm:$0xff]   ;;  %v1684_v15 = vld [vmem:[#allocation5 + $0xc] ss:$16 sps:$4 sm:$0xff]  }
  0x5f   :  { %522 = vmatpush1.bf16.msra.mxu0 %v1639_v2  ;;  %v1643_v5 = vld [vmem:[#allocation5 + $0x44] ss:$16 sps:$4 sm:$0xff]   ;;  %v1645_v6 = vld [vmem:[#allocation5 + $0x40] ss:$16 sps:$4 sm:$0xff]   ;;  %v1687_v17 = vld [vmem:[#allocation5 + $0x8] ss:$16 sps:$4 sm:$0xff]   ;;  %562 = vmatprep.subr.bf16.mxu1 %v1684_v15 }
  0x60   :  { %523 = vmatprep.subr.bf16.mxu0 %v1640_v3  ;;  %v1646_v7 = vld [vmem:[#allocation5 + $0x64] ss:$16 sps:$4 sm:$0xff]   ;;  %v1648_v8 = vld [vmem:[#allocation5 + $0x60] ss:$16 sps:$4 sm:$0xff]   ;;  %v2120_v18 = vld [vmem:[#allocation3] sm:$0xff]  ;;  %563 = vmatpush1.bf16.msra.mxu1 %v1687_v17  ;;  %vm1983_vm0 = vmmov 0  }
  0x61   :  { %v1649_v9 = vld [vmem:[#allocation5 + $0x84] ss:$16 sps:$4 sm:$0xff]   ;;  %v1651_v10 = vld [vmem:[#allocation5 + $0x80] ss:$16 sps:$4 sm:$0xff]   ;;  %v1410_v19 = vcombine.high %v2120_v18, %v2120_v18  ;;  %v1690_v20 = vld [vmem:[#allocation5 + $0x2c] ss:$16 sps:$4 sm:$0xff]   ;;  %v1409_v60 = vcombine.low %v2120_v18, %v2120_v18 }
  0x62   :  { %v1652_v11 = vld [vmem:[#allocation5 + $0xa4] ss:$16 sps:$4 sm:$0xff]   ;;  %v1654_v12 = vld [vmem:[#allocation5 + $0xa0] ss:$16 sps:$4 sm:$0xff]   ;;  %v1692_v21 = vld [vmem:[#allocation5 + $0x28] ss:$16 sps:$4 sm:$0xff]   ;;  %564 = vmatprep.subr.bf16.mxu1 %v1690_v20 }
  0x63   :  { %524 = vmatpush1.bf16.msra.mxu0 %v1642_v4  ;;  %v1655_v13 = vld [vmem:[#allocation5 + $0xc4] ss:$16 sps:$4 sm:$0xff]   ;;  %v1657_v14 = vld [vmem:[#allocation5 + $0xc0] ss:$16 sps:$4 sm:$0xff]   ;;  %553 = vmatprep.mubr.bf16.mxu0 %v1410_v19  ;;  %v1693_v22 = vld [vmem:[#allocation5 + $0x4c] ss:$16 sps:$4 sm:$0xff]  }
  0x64   :  { %525 = vmatprep.subr.bf16.mxu0 %v1643_v5  ;;  %v1658_v16 = vld [vmem:[#allocation5 + $0xe4] ss:$16 sps:$4 sm:$0xff]   ;;  %v1660_v23 = vld [vmem:[#allocation5 + $0xe0] ss:$16 sps:$4 sm:$0xff]   ;;  %594 = vmatprep.mubr.bf16.mxu1 %v1410_v19  ;;  %v1695_v25 = vld [vmem:[#allocation5 + $0x48] ss:$16 sps:$4 sm:$0xff]  }
  0x65   :  { %v1661_v24 = vld [vmem:[#allocation5 + $0x104] ss:$16 sps:$4 sm:$0xff]   ;;  %565 = vmatpush1.bf16.msra.mxu1 %v1692_v21  ;;  %v1696_v26 = vld [vmem:[#allocation5 + $0x6c] ss:$16 sps:$4 sm:$0xff]   ;;  %v1663_v27 = vld [vmem:[#allocation5 + $0x100] ss:$16 sps:$4 sm:$0xff]  }
  0x66   :  { %566 = vmatprep.subr.bf16.mxu1 %v1693_v22  ;;  %v1664_v28 = vld [vmem:[#allocation5 + $0x124] ss:$16 sps:$4 sm:$0xff]   ;;  %v1698_v29 = vld [vmem:[#allocation5 + $0x68] ss:$16 sps:$4 sm:$0xff]   ;;  %v1699_v30 = vld [vmem:[#allocation5 + $0x8c] ss:$16 sps:$4 sm:$0xff]  }
  0x67   :  { %526 = vmatpush1.bf16.msra.mxu0 %v1645_v6  ;;  %v1666_v31 = vld [vmem:[#allocation5 + $0x120] ss:$16 sps:$4 sm:$0xff]   ;;  %v1667_v32 = vld [vmem:[#allocation5 + $0x144] ss:$16 sps:$4 sm:$0xff]   ;;  %v1701_v33 = vld [vmem:[#allocation5 + $0x88] ss:$16 sps:$4 sm:$0xff]  }
  0x68   :  { %527 = vmatprep.subr.bf16.mxu0 %v1646_v7  ;;  %v1702_v34 = vld [vmem:[#allocation5 + $0xac] ss:$16 sps:$4 sm:$0xff]   ;;  %v1669_v35 = vld [vmem:[#allocation5 + $0x140] ss:$16 sps:$4 sm:$0xff]   ;;  %v1670_v36 = vld [vmem:[#allocation5 + $0x164] ss:$16 sps:$4 sm:$0xff]  }
  0x69   :  { %567 = vmatpush1.bf16.msra.mxu1 %v1695_v25  ;;  %v1704_v37 = vld [vmem:[#allocation5 + $0xa8] ss:$16 sps:$4 sm:$0xff]   ;;  %v1705_v38 = vld [vmem:[#allocation5 + $0xcc] ss:$16 sps:$4 sm:$0xff]   ;;  %v1672_v39 = vld [vmem:[#allocation5 + $0x160] ss:$16 sps:$4 sm:$0xff]  }
  0x6a   :  { %568 = vmatprep.subr.bf16.mxu1 %v1696_v26  ;;  %v1673_v40 = vld [vmem:[#allocation5 + $0x184] ss:$16 sps:$4 sm:$0xff]   ;;  %v1707_v41 = vld [vmem:[#allocation5 + $0xc8] ss:$16 sps:$4 sm:$0xff]   ;;  %v1708_v42 = vld [vmem:[#allocation5 + $0xec] ss:$16 sps:$4 sm:$0xff]  }
  0x6b   :  { %528 = vmatpush1.bf16.msra.mxu0 %v1648_v8  ;;  %v1675_v43 = vld [vmem:[#allocation5 + $0x180] ss:$16 sps:$4 sm:$0xff]   ;;  %v1676_v44 = vld [vmem:[#allocation5 + $0x1a4] ss:$16 sps:$4 sm:$0xff]   ;;  %v1710_v45 = vld [vmem:[#allocation5 + $0xe8] ss:$16 sps:$4 sm:$0xff]  }
  0x6c   :  { %529 = vmatprep.subr.bf16.mxu0 %v1649_v9  ;;  %v1711_v46 = vld [vmem:[#allocation5 + $0x10c] ss:$16 sps:$4 sm:$0xff]   ;;  %v1678_v47 = vld [vmem:[#allocation5 + $0x1a0] ss:$16 sps:$4 sm:$0xff]   ;;  %v1679_v48 = vld [vmem:[#allocation5 + $0x1c4] ss:$16 sps:$4 sm:$0xff]  }
  0x6d   :  { %569 = vmatpush1.bf16.msra.mxu1 %v1698_v29  ;;  %v1713_v49 = vld [vmem:[#allocation5 + $0x108] ss:$16 sps:$4 sm:$0xff]   ;;  %v1714_v50 = vld [vmem:[#allocation5 + $0x12c] ss:$16 sps:$4 sm:$0xff]   ;;  %v1681_v51 = vld [vmem:[#allocation5 + $0x1c0] ss:$16 sps:$4 sm:$0xff]  }
  0x6e   :  { %570 = vmatprep.subr.bf16.mxu1 %v1699_v30  ;;  %v1682_v52 = vld [vmem:[#allocation5 + $0x1e4] ss:$16 sps:$4 sm:$0xff]   ;;  %v1716_v53 = vld [vmem:[#allocation5 + $0x128] ss:$16 sps:$4 sm:$0xff]   ;;  %v1717_v54 = vld [vmem:[#allocation5 + $0x14c] ss:$16 sps:$4 sm:$0xff]  }
  0x6f   :  { %530 = vmatpush1.bf16.msra.mxu0 %v1651_v10  ;;  %v1686_v55 = vld [vmem:[#allocation5 + $0x1e0] ss:$16 sps:$4 sm:$0xff]   ;;  %v1719_v56 = vld [vmem:[#allocation5 + $0x148] ss:$16 sps:$4 sm:$0xff]   ;;  %v1737_v57 = vld [vmem:[#allocation7 + $0x4] ss:$8 sps:$4 sm:$0xff]  }
  0x70   :  { %531 = vmatprep.subr.bf16.mxu0 %v1652_v11  ;;  %v1720_v58 = vld [vmem:[#allocation5 + $0x16c] ss:$16 sps:$4 sm:$0xff]   ;;  %v1735_v59 = vld [vmem:[#allocation7] ss:$8 sps:$4 sm:$0xff]   ;;  %v1738_v0 = vld [vmem:[#allocation7 + $0x10] ss:$8 sps:$4 sm:$0xff]  }
  0x71   :  { %571 = vmatpush1.bf16.msra.mxu1 %v1701_v33  ;;  %v1722_v61 = vld [vmem:[#allocation5 + $0x168] ss:$16 sps:$4 sm:$0xff]   ;;  %v1740_v62 = vld [vmem:[#allocation7 + $0x14] ss:$8 sps:$4 sm:$0xff]   ;;  %v1743_v2 = vld [vmem:[#allocation7 + $0x24] ss:$8 sps:$4 sm:$0xff]  }
  0x72   :  { %572 = vmatprep.subr.bf16.mxu1 %v1702_v34  ;;  %v1723_v63 = vld [vmem:[#allocation5 + $0x18c] ss:$16 sps:$4 sm:$0xff]   ;;  %v1725_v1 = vld [vmem:[#allocation5 + $0x188] ss:$16 sps:$4 sm:$0xff]   ;;  %vm1400_vm1 = vcmask 7168  }
  0x73   :  { %532 = vmatpush1.bf16.msra.mxu0 %v1654_v12  ;;  %v1726_v3 = vld [vmem:[#allocation5 + $0x1ac] ss:$16 sps:$4 sm:$0xff]   ;;  %v1741_v4 = vld [vmem:[#allocation7 + $0x20] ss:$8 sps:$4 sm:$0xff]   ;;  %v1744_v8 = vld [vmem:[#allocation7 + $0x30] ss:$8 sps:$4 sm:$0xff]  }
  0x74   :  { %533 = vmatprep.subr.bf16.mxu0 %v1655_v13  ;;  %v1728_v5 = vld [vmem:[#allocation5 + $0x1a8] ss:$16 sps:$4 sm:$0xff]   ;;  %v1746_v6 = vld [vmem:[#allocation7 + $0x34] ss:$8 sps:$4 sm:$0xff]   ;;  %v1749_v10 = vld [vmem:[#allocation7 + $0x44] ss:$8 sps:$4 sm:$0xff]  }
  0x75   :  { %573 = vmatpush1.bf16.msra.mxu1 %v1704_v37  ;;  %v1729_v7 = vld [vmem:[#allocation5 + $0x1cc] ss:$16 sps:$4 sm:$0xff]   ;;  %v1731_v9 = vld [vmem:[#allocation5 + $0x1c8] ss:$16 sps:$4 sm:$0xff]   ;;  %v1831_v37 = vld [vmem:[#allocation8 + $0x40] sm:$0xff]  }
  0x76   :  { %574 = vmatprep.subr.bf16.mxu1 %v1705_v38  ;;  %v1732_v11 = vld [vmem:[#allocation5 + $0x1ec] ss:$16 sps:$4 sm:$0xff]   ;;  %v1747_v12 = vld [vmem:[#allocation7 + $0x40] ss:$8 sps:$4 sm:$0xff]   ;;  %v1750_v15 = vld [vmem:[#allocation7 + $0x50] ss:$8 sps:$4 sm:$0xff]  }
  0x77   :  { %534 = vmatpush1.bf16.msra.mxu0 %v1657_v14  ;;  %v1734_v13 = vld [vmem:[#allocation5 + $0x1e8] ss:$16 sps:$4 sm:$0xff]   ;;  %v1752_v14 = vld [vmem:[#allocation7 + $0x54] ss:$8 sps:$4 sm:$0xff]   ;;  %v1761_v20 = vld [vmem:[#allocation7 + $0x84] ss:$8 sps:$4 sm:$0xff]  }
  0x78   :  { %535 = vmatprep.subr.bf16.mxu0 %v1658_v16  ;;  %v1755_v16 = vld [vmem:[#allocation7 + $0x64] ss:$8 sps:$4 sm:$0xff]   ;;  %v1753_v17 = vld [vmem:[#allocation7 + $0x60] ss:$8 sps:$4 sm:$0xff]   ;;  %v1758_v18 = vld [vmem:[#allocation7 + $0x74] ss:$8 sps:$4 sm:$0xff]  }
  0x79   :  { %575 = vmatpush1.bf16.msra.mxu1 %v1707_v41  ;;  %v1756_v19 = vld [vmem:[#allocation7 + $0x70] ss:$8 sps:$4 sm:$0xff]   ;;  %v1759_v21 = vld [vmem:[#allocation7 + $0x80] ss:$8 sps:$4 sm:$0xff]   ;;  %v1764_v22 = vld [vmem:[#allocation7 + $0x94] ss:$8 sps:$4 sm:$0xff]  }
  0x7a   :  { %576 = vmatprep.subr.bf16.mxu1 %v1708_v42  ;;  %v1765_v25 = vld [vmem:[#allocation7 + $0xa0] ss:$8 sps:$4 sm:$0xff]   ;;  %v1770_v26 = vld [vmem:[#allocation7 + $0xb4] ss:$8 sps:$4 sm:$0xff]  }
  0x7b   :  { %536 = vmatpush1.bf16.msra.mxu0 %v1660_v23  ;;  %v1762_v23 = vld [vmem:[#allocation7 + $0x90] ss:$8 sps:$4 sm:$0xff]   ;;  %v1771_v29 = vld [vmem:[#allocation7 + $0xc0] ss:$8 sps:$4 sm:$0xff]   ;;  %v1776_v30 = vld [vmem:[#allocation7 + $0xd4] ss:$8 sps:$4 sm:$0xff]  }
  0x7c   :  { %537 = vmatprep.subr.bf16.mxu0 %v1661_v24  ;;  %v1767_v24 = vld [vmem:[#allocation7 + $0xa4] ss:$8 sps:$4 sm:$0xff]   ;;  %v1777_v33 = vld [vmem:[#allocation7 + $0xe0] ss:$8 sps:$4 sm:$0xff]   ;;  %v1782_v34 = vld [vmem:[#allocation7 + $0xf4] ss:$8 sps:$4 sm:$0xff]  }
  0x7d   :  { %577 = vmatpush1.bf16.msra.mxu1 %v1710_v45  ;;  %v1832_v38 = vld [vmem:[#allocation8] sm:$0xff]   ;;  %v1835_v41 = vld [vmem:[#allocation8 + $0x50] sm:$0xff]  }
  0x7e   :  { %578 = vmatprep.subr.bf16.mxu1 %v1711_v46  ;;  %v1836_v42 = vld [vmem:[#allocation8 + $0x10] sm:$0xff]   ;;  %v1839_v45 = vld [vmem:[#allocation8 + $0x60] sm:$0xff]  }
  0x7f   :  { %538 = vmatpush1.bf16.msra.mxu0 %v1663_v27  ;;  %v1768_v27 = vld [vmem:[#allocation7 + $0xb0] ss:$8 sps:$4 sm:$0xff]   ;;  %v1840_v46 = vld [vmem:[#allocation8 + $0x20] sm:$0xff]  }
  0x80   :  { %539 = vmatprep.subr.bf16.mxu0 %v1664_v28  ;;  %v1773_v28 = vld [vmem:[#allocation7 + $0xc4] ss:$8 sps:$4 sm:$0xff]  }
  0x81   :  { %579 = vmatpush1.bf16.msra.mxu1 %v1713_v49  ;;  %v174_v49 = vlaneseq }
  0x82   :  { %580 = vmatprep.subr.bf16.mxu1 %v1714_v50 }
  0x83   :  { %540 = vmatpush1.bf16.msra.mxu0 %v1666_v31  ;;  %v1774_v31 = vld [vmem:[#allocation7 + $0xd0] ss:$8 sps:$4 sm:$0xff]   ;;  %v2126_v50 = vshrl.u32 %v174_v49, 7 }
  0x84   :  { %541 = vmatprep.subr.bf16.mxu0 %v1667_v32  ;;  %v1779_v32 = vld [vmem:[#allocation7 + $0xe4] ss:$8 sps:$4 sm:$0xff]   ;;  %v1845_v49 = vld [vmem:[#allocation8 + $0x78] sm:$0xff]  }
  0x85   :  { %581 = vmatpush1.bf16.msra.mxu1 %v1716_v53  ;;  %v180_v53 = vsub.s32 1, %v2126_v50 }
  0x86   :  { %582 = vmatprep.subr.bf16.mxu1 %v1717_v54 }
  0x87   :  { %542 = vmatpush1.bf16.msra.mxu0 %v1669_v35  ;;  %v1780_v35 = vld [vmem:[#allocation7 + $0xf0] ss:$8 sps:$4 sm:$0xff]  }
  0x88   :  { %543 = vmatprep.subr.bf16.mxu0 %v1670_v36  ;;  %v1785_v36 = vld [vmem:[#allocation7 + $0x104] ss:$8 sps:$4 sm:$0xff]  }
  0x89   :  { %583 = vmatpush1.bf16.msra.mxu1 %v1719_v56 }
  0x8a   :  { %584 = vmatprep.subr.bf16.mxu1 %v1720_v58 }
  0x8b   :  { %544 = vmatpush1.bf16.msra.mxu0 %v1672_v39  ;;  %v1833_v39 = vld [vmem:[#allocation8 + $0x48] sm:$0xff]  }
  0x8c   :  { %545 = vmatprep.subr.bf16.mxu0 %v1673_v40  ;;  %v1834_v40 = vld [vmem:[#allocation8 + $0x8] sm:$0xff]  }
  0x8d   :  { %585 = vmatpush1.bf16.msra.mxu1 %v1722_v61 }
  0x8e   :  { %586 = vmatprep.subr.bf16.mxu1 %v1723_v63 }
  0x8f   :  { %546 = vmatpush1.bf16.msra.mxu0 %v1675_v43  ;;  %v1837_v43 = vld [vmem:[#allocation8 + $0x58] sm:$0xff]  }
  0x90   :  { %547 = vmatprep.subr.bf16.mxu0 %v1676_v44  ;;  %v1838_v44 = vld [vmem:[#allocation8 + $0x18] sm:$0xff]  }
  0x91   :  { %587 = vmatpush1.bf16.msra.mxu1 %v1725_v1  ;;  %v1783_v1 = vld [vmem:[#allocation7 + $0x100] ss:$8 sps:$4 sm:$0xff]  }
  0x92   :  { %588 = vmatprep.subr.bf16.mxu1 %v1726_v3  ;;  %v1788_v3 = vld [vmem:[#allocation7 + $0x114] ss:$8 sps:$4 sm:$0xff]  }
  0x93   :  { %548 = vmatpush1.bf16.msra.mxu0 %v1678_v47  ;;  %v1841_v47 = vld [vmem:[#allocation8 + $0x68] sm:$0xff]  }
  0x94   :  { %549 = vmatprep.subr.bf16.mxu0 %v1679_v48  ;;  %v1842_v48 = vld [vmem:[#allocation8 + $0x28] sm:$0xff]  }
  0x95   :  { %589 = vmatpush1.bf16.msra.mxu1 %v1728_v5  ;;  %v1791_v5 = vld [vmem:[#allocation7 + $0x124] ss:$8 sps:$4 sm:$0xff]  }
  0x96   :  { %590 = vmatprep.subr.bf16.mxu1 %v1729_v7  ;;  %v1794_v7 = vld [vmem:[#allocation7 + $0x134] ss:$8 sps:$4 sm:$0xff]  }
  0x97   :  { %550 = vmatpush1.bf16.msra.mxu0 %v1681_v51  ;;  %v176_v51 = vsub.s32 0, %v2126_v50 }
  0x98   :  { %551 = vmatprep.subr.bf16.mxu0 %v1682_v52  ;;  %v2132_v52 = vld [vmem:[%s2166_s2] sm:$0xf] }
  0x99   :  { %591 = vmatpush1.bf16.msra.mxu1 %v1731_v9  ;;  %v177_v54 = vrot.slane %v2132_v52, %v176_v51  ;;  %v1792_v9 = vld [vmem:[#allocation7 + $0x130] ss:$8 sps:$4 sm:$0xff]  }
  0x9a   :  { %592 = vmatprep.subr.bf16.mxu1 %v1732_v11 }
  0x9b   :  { %552 = vmatpush1.bf16.msra.mxu0 %v1686_v55  ;;  %v181_v55 = vrot.slane %v2132_v52, %v180_v53 }
  0x9c   :  { %1007 = vmatprep.subr.bf16.mxu0 %v1737_v57 }
  0x9d   :  { %593 = vmatpush1.bf16.msra.mxu1 %v1734_v13  ;;  %v1795_v13 = vld [vmem:[#allocation7 + $0x140] ss:$8 sps:$4 sm:$0xff]  }
  0x9e   :  { %554 = vmatmul.mubr.bf16.vlgmr.msra.gmra.mrb[0].mxu0 %v1409_v60  ;;  %1567 = vmatprep.subr.bf16.mxu1 %v1831_v37  ;;  %v1824_v37 = vld [vmem:[#allocation7 + $0x1d4] ss:$8 sps:$4 sm:$0xff]  }
  0x9f   :  { %1008 = vmatpush1.bf16.msra.mxu0 %v1735_v59 }
  0xa0   :  { %1009 = vmatprep.subr.bf16.mxu0 %v1740_v62  ;;  %595 = vmatmul.mubr.bf16.vlgmr.msra.gmra.mrb[0].mxu1 %v1409_v60 }
  0xa1   :  { %1568 = vmatpush3.bf16.msra.mxu1 %v1832_v38  ;;  %v1822_v38 = vld [vmem:[#allocation7 + $0x1d0] ss:$8 sps:$4 sm:$0xff]  }
  0xa2   :  { %1569 = vmatprep.subr.bf16.mxu1 %v1833_v39 }
  0xa3   :  { %1010 = vmatpush1.bf16.msra.mxu0 %v1738_v0 }
  0xa4   :  { %1011 = vmatprep.subr.bf16.mxu0 %v1743_v2 }
  0xa5   :  { %1570 = vmatpush3.bf16.msra.mxu1 %v1834_v40  ;;  %v1827_v40 = vld [vmem:[#allocation7 + $0x1e4] ss:$8 sps:$4 sm:$0xff]  }
  0xa6   :  { %1571 = vmatprep.subr.bf16.mxu1 %v1835_v41  ;;  %v1825_v41 = vld [vmem:[#allocation7 + $0x1e0] ss:$8 sps:$4 sm:$0xff]  }
  0xa7   :  { %1012 = vmatpush1.bf16.msra.mxu0 %v1741_v4  ;;  %v1786_v4 = vld [vmem:[#allocation7 + $0x110] ss:$8 sps:$4 sm:$0xff]  }
  0xa8   :  { %1013 = vmatprep.subr.bf16.mxu0 %v1746_v6  ;;  %v1789_v6 = vld [vmem:[#allocation7 + $0x120] ss:$8 sps:$4 sm:$0xff]  }
  0xa9   :  { %1572 = vmatpush3.bf16.msra.mxu1 %v1836_v42 }
  0xaa   :  { %1573 = vmatprep.subr.bf16.mxu1 %v1837_v43  ;;  %v1830_v43 = vld [vmem:[#allocation7 + $0x1f4] ss:$8 sps:$4 sm:$0xff]  }
  0xab   :  { %1014 = vmatpush1.bf16.msra.mxu0 %v1744_v8  ;;  %v188_v8 = vsub.s32 3, %v2126_v50 }
  0xac   :  { %1015 = vmatprep.subr.bf16.mxu0 %v1749_v10  ;;  %v1797_v10 = vld [vmem:[#allocation7 + $0x144] ss:$8 sps:$4 sm:$0xff]  }
  0xad   :  { %1574 = vmatpush3.bf16.msra.mxu1 %v1838_v44  ;;  %v189_v11 = vrot.slane %v2132_v52, %v188_v8  ;;  %v1828_v44 = vld [vmem:[#allocation7 + $0x1f0] ss:$8 sps:$4 sm:$0xff]  }
  0xae   :  { %1575 = vmatprep.subr.bf16.mxu1 %v1839_v45  ;;  %v1854_v8 = vld [vmem:[#allocation10 + $0x38] sm:$0xff]  }
  0xaf   :  { %1016 = vmatpush1.bf16.msra.mxu0 %v1747_v12 }
  0xb0   :  { %1017 = vmatprep.subr.bf16.mxu0 %v1752_v14 }
  0xb1   :  { %1576 = vmatpush3.bf16.msra.mxu1 %v1840_v46 }
  0xb2   :  { %1577 = vmatprep.subr.bf16.mxu1 %v1841_v47  ;;  %v1843_v47 = vld [vmem:[#allocation8 + $0x70] sm:$0xff]  }
  0xb3   :  { %1018 = vmatpush1.bf16.msra.mxu0 %v1750_v15  ;;  %v1800_v15 = vld [vmem:[#allocation7 + $0x154] ss:$8 sps:$4 sm:$0xff]  }
  0xb4   :  { %1019 = vmatprep.subr.bf16.mxu0 %v1755_v16 }
  0xb5   :  { %1578 = vmatpush3.bf16.msra.mxu1 %v1842_v48  ;;  %v1844_v48 = vld [vmem:[#allocation8 + $0x30] sm:$0xff]  }
  0xb6   :  { %1579 = vmatprep.subr.bf16.mxu1 %v1843_v47 }
  0xb7   :  { %1020 = vmatpush1.bf16.msra.mxu0 %v1753_v17 }
  0xb8   :  { %1021 = vmatprep.subr.bf16.mxu0 %v1758_v18 }
  0xb9   :  { %1580 = vmatpush3.bf16.msra.mxu1 %v1844_v48 }
  0xba   :  { %1581 = vmatprep.subr.bf16.mxu1 %v1845_v49 }
  0xbb   :  { %1022 = vmatpush1.bf16.msra.mxu0 %v1756_v19 }
  0xbc   :  { %1023 = vmatprep.subr.bf16.mxu0 %v1761_v20  ;;  %v1798_v20 = vld [vmem:[#allocation7 + $0x150] ss:$8 sps:$4 sm:$0xff]  }
  0xbf   :  { %1024 = vmatpush1.bf16.msra.mxu0 %v1759_v21  ;;  %v1803_v21 = vld [vmem:[#allocation7 + $0x164] ss:$8 sps:$4 sm:$0xff]  }
  0xc0   :  { %1025 = vmatprep.subr.bf16.mxu0 %v1764_v22 }
  0xc3   :  { %1026 = vmatpush1.bf16.msra.mxu0 %v1762_v23  ;;  %v1801_v23 = vld [vmem:[#allocation7 + $0x160] ss:$8 sps:$4 sm:$0xff]  }
  0xc4   :  { %1027 = vmatprep.subr.bf16.mxu0 %v1767_v24  ;;  %v1806_v24 = vld [vmem:[#allocation7 + $0x174] ss:$8 sps:$4 sm:$0xff]  }
  0xc7   :  { %1028 = vmatpush1.bf16.msra.mxu0 %v1765_v25  ;;  %v1804_v25 = vld [vmem:[#allocation7 + $0x170] ss:$8 sps:$4 sm:$0xff]  }
  0xc8   :  { %1029 = vmatprep.subr.bf16.mxu0 %v1770_v26  ;;  %v1809_v26 = vld [vmem:[#allocation7 + $0x184] ss:$8 sps:$4 sm:$0xff]  }
  0xcb   :  { %1030 = vmatpush1.bf16.msra.mxu0 %v1768_v27  ;;  %v1807_v27 = vld [vmem:[#allocation7 + $0x180] ss:$8 sps:$4 sm:$0xff]  }
  0xcc   :  { %1031 = vmatprep.subr.bf16.mxu0 %v1773_v28  ;;  %v1812_v28 = vld [vmem:[#allocation7 + $0x194] ss:$8 sps:$4 sm:$0xff]  }
  0xcf   :  { %1032 = vmatpush1.bf16.msra.mxu0 %v1771_v29  ;;  %v1810_v29 = vld [vmem:[#allocation7 + $0x190] ss:$8 sps:$4 sm:$0xff]  }
  0xd0   :  { %1033 = vmatprep.subr.bf16.mxu0 %v1776_v30  ;;  %v1815_v30 = vld [vmem:[#allocation7 + $0x1a4] ss:$8 sps:$4 sm:$0xff]  }
  0xd3   :  { %1034 = vmatpush1.bf16.msra.mxu0 %v1774_v31  ;;  %v1813_v31 = vld [vmem:[#allocation7 + $0x1a0] ss:$8 sps:$4 sm:$0xff]  }
  0xd4   :  { %1035 = vmatprep.subr.bf16.mxu0 %v1779_v32  ;;  %v1818_v32 = vld [vmem:[#allocation7 + $0x1b4] ss:$8 sps:$4 sm:$0xff]  }
  0xd7   :  { %1036 = vmatpush1.bf16.msra.mxu0 %v1777_v33  ;;  %v1816_v33 = vld [vmem:[#allocation7 + $0x1b0] ss:$8 sps:$4 sm:$0xff]  }
  0xd8   :  { %1037 = vmatprep.subr.bf16.mxu0 %v1782_v34  ;;  %v1821_v34 = vld [vmem:[#allocation7 + $0x1c4] ss:$8 sps:$4 sm:$0xff]  }
  0xdb   :  { %1038 = vmatpush1.bf16.msra.mxu0 %v1780_v35  ;;  %v1819_v35 = vld [vmem:[#allocation7 + $0x1c0] ss:$8 sps:$4 sm:$0xff]  }
  0xdc   :  { %1048 = vmatprep.subr.bf16.mxu0 %v1785_v36  ;;  %v184_v36 = vsub.s32 2, %v2126_v50  ;;  %v1850_v50 = vld [vmem:[#allocation10 + $0x18] sm:$0xff]  }
  0xde   :  { %v185_v39 = vrot.slane %v2132_v52, %v184_v36  ;;  %v1846_v52 = vld [vmem:[#allocation8 + $0x38] sm:$0xff]  }
  0xdf   :  { %1582 = vmatpush3.bf16.msra.mxu1 %v1846_v52 }
 0x171   :  { %v555_v56 = vpop.f32.mrb[0].mxu0 }
 0x172   :  { %v556_v57 = vadd.f32 %v555_v56, %v177_v54  ;;  %v557_v58 = vpop.f32.mrb[1].mxu0  ;;  %v1982_v54 = vmov 0.0  }
 0x173   :  { %v558_v59 = vadd.f32 %v557_v58, %v181_v55  ;;  %v559_v60 = vpop.f32.mrb[2].mxu0  ;;  %v596_v12 = vpop.f32.mrb[0].mxu1  ;;  %1598 = vmatprep.subr.bf16.mxu1 %v1982_v54  ;;  %v675_v55 = vld [vmem:[%s2168_s4] sm:$0x3] }
 0x174   :  { %v603_v61 = vmax.f32 %v556_v57, 0.0  ;;  %v560_v62 = vpop.f32.mrb[3].mxu0  ;;  %v598_v14 = vpop.f32.mrb[1].mxu1  ;;  %v597_v42 = vadd.f32 %v596_v12, %v185_v39  ;;  %v680_v56 = vrot.slane %v675_v55, %v176_v51  ;;  %v684_v57 = vrot.slane %v675_v55, %v180_v53  ;;  %v1849_v51 = vld [vmem:[#allocation10 + $0x10] sm:$0xff]   ;;  %v1851_v53 = vld [vmem:[#allocation10 + $0x20] sm:$0xff]  }
 0x175   :  { %v604_v63 = vmax.f32 %v558_v59, 0.0  ;;  %v599_v16 = vadd.f32 %v598_v14, %v189_v11  ;;  %v600_v17 = vpop.f32.mrb[2].mxu1 }
 0x176   :  { %v607_v2 = vpack.c.bf16 %v603_v61, %v603_v61  ;;  %v601_v18 = vpop.f32.mrb[3].mxu1  ;;  %v605_v45 = vmax.f32 %v597_v42, 0.0 }
 0x177   :  { %v608_v0 = vpack.c.bf16 %v604_v63, %v604_v63  ;;  %v606_v19 = vmax.f32 %v599_v16, 0.0  ;;  %v1556_v18 = vld [vmem:[%s2172_s8] ss:$0 sm:$0xff] }
 0x178   :  { %v609_v46 = vpack.c.bf16 %v605_v45, %v605_v45 }
 0x179   :  { %1039 = vmatprep.mubr.bf16.mxu0 %v608_v0  ;;  %v610_v22 = vpack.c.bf16 %v606_v19, %v606_v19 }
 0x17a   :  { %1040 = vmatmul.mubr.bf16.vlgmr.msra.gmra.mrb[4].mxu0 %v607_v2 }
 0x17b   :  { %1049 = vmatpush1.bf16.msra.mxu0 %v1783_v1  ;;  %1080 = vmatprep.mubr.bf16.mxu0 %v610_v22 }
 0x17c   :  { %1050 = vmatprep.subr.bf16.mxu0 %v1788_v3  ;;  %v1847_v3 = vld [vmem:[#allocation10] sm:$0xff]  }
 0x17f   :  { %1051 = vmatpush1.bf16.msra.mxu0 %v1786_v4 }
 0x180   :  { %1052 = vmatprep.subr.bf16.mxu0 %v1791_v5  ;;  %v1848_v5 = vld [vmem:[#allocation10 + $0x8] sm:$0xff]  }
 0x183   :  { %1053 = vmatpush1.bf16.msra.mxu0 %v1789_v6  ;;  %v1852_v6 = vld [vmem:[#allocation10 + $0x28] sm:$0xff]  }
 0x184   :  { %1054 = vmatprep.subr.bf16.mxu0 %v1794_v7  ;;  %v1853_v7 = vld [vmem:[#allocation10 + $0x30] sm:$0xff]  }
 0x187   :  { %1055 = vmatpush1.bf16.msra.mxu0 %v1792_v9 }
 0x188   :  { %1056 = vmatprep.subr.bf16.mxu0 %v1797_v10  ;;  %v1539_v10 = vld [vmem:[%s2170_s6] ss:$0 sm:$0xff] }
 0x18b   :  { %1057 = vmatpush1.bf16.msra.mxu0 %v1795_v13 }
 0x18c   :  { %1058 = vmatprep.subr.bf16.mxu0 %v1800_v15 }
 0x18f   :  { %1059 = vmatpush1.bf16.msra.mxu0 %v1798_v20 }
 0x190   :  { %1060 = vmatprep.subr.bf16.mxu0 %v1803_v21 }
 0x193   :  { %1061 = vmatpush1.bf16.msra.mxu0 %v1801_v23  ;;  %v1565_v23 = vld [vmem:[%s2173_s9] ss:$0 sm:$0xff] }
 0x194   :  { %1062 = vmatprep.subr.bf16.mxu0 %v1806_v24 }
 0x197   :  { %1063 = vmatpush1.bf16.msra.mxu0 %v1804_v25 }
 0x198   :  { %1064 = vmatprep.subr.bf16.mxu0 %v1809_v26 }
 0x19b   :  { %1065 = vmatpush1.bf16.msra.mxu0 %v1807_v27  ;;  %v1566_v27 = vld [vmem:[#allocation2] ss:$0 sm:$0xff] }
 0x19c   :  { %1066 = vmatprep.subr.bf16.mxu0 %v1812_v28 }
 0x19f   :  { %1067 = vmatpush1.bf16.msra.mxu0 %v1810_v29 }
 0x1a0   :  { %1068 = vmatprep.subr.bf16.mxu0 %v1815_v30 }
 0x1a3   :  { %1069 = vmatpush1.bf16.msra.mxu0 %v1813_v31 }
 0x1a4   :  { %1070 = vmatprep.subr.bf16.mxu0 %v1818_v32 }
 0x1a7   :  { %1071 = vmatpush1.bf16.msra.mxu0 %v1816_v33 }
 0x1a8   :  { %1072 = vmatprep.subr.bf16.mxu0 %v1821_v34 }
 0x1ab   :  { %1073 = vmatpush1.bf16.msra.mxu0 %v1819_v35 }
 0x1ac   :  { %1074 = vmatprep.subr.bf16.mxu0 %v1824_v37 }
 0x1af   :  { %1075 = vmatpush1.bf16.msra.mxu0 %v1822_v38 }
 0x1b0   :  { %1076 = vmatprep.subr.bf16.mxu0 %v1827_v40 }
 0x1b3   :  { %1077 = vmatpush1.bf16.msra.mxu0 %v1825_v41 }
 0x1b4   :  { %1078 = vmatprep.subr.bf16.mxu0 %v1830_v43 }
 0x1b7   :  { %1079 = vmatpush1.bf16.msra.mxu0 %v1828_v44 }
 0x1ba   :  { %1081 = vmatmul.mubr.bf16.vlgmr.msra.gmra.mrb[4].mxu0 %v609_v46 }
 0x28d   :  { %v1082_v58 = vpop.f32.mrb[4].mxu0 }
 0x28e   :  { %v1618_v59 = vadd.f32 %v1082_v58, %v680_v56  ;;  %v1084_v60 = vpop.f32.mrb[5].mxu0 }
 0x28f   :  { %v1619_v61 = vadd.f32 %v1084_v60, %v684_v57  ;;  %v1086_v62 = vpop.f32.mrb[6].mxu0 }
 0x290   :  { %v1089_v63 = vmax.f32 %v1618_v59, 0.0  ;;  %v1087_v0 = vpop.f32.mrb[7].mxu0 }
 0x291   :  { %v1090_v1 = vmax.f32 %v1619_v61, 0.0 }
 0x292   :  { %v1091_v4 = vpack.c.bf16 %v1089_v63, %v1089_v63 }
 0x293   :  { %v1092_v2 = vpack.c.bf16 %v1090_v1, %v1090_v1 }
 0x295   :  { %1260 = vmatprep.mubr.bf16.mxu1 %v1092_v2 }
 0x296   :  { %1261 = vmatmul.mubr.bf16.vlgmr.msra.gmra.mrb[4].mxu1 %v1091_v4 }
 0x297   :  { %1599 = vmatpush3.bf16.msra.mxu1 %v1847_v3  ;;  %1614 = vmatprep.mubr.msk.bf16.mxu1 %vm1983_vm0, %v1982_v54 }
 0x298   :  { %1600 = vmatprep.subr.bf16.mxu1 %v1982_v54 }
 0x29b   :  { %1601 = vmatpush3.bf16.msra.mxu1 %v1848_v5 }
 0x29c   :  { %1602 = vmatprep.subr.bf16.mxu1 %v1982_v54 }
 0x29f   :  { %1603 = vmatpush3.bf16.msra.mxu1 %v1849_v51 }
 0x2a0   :  { %1604 = vmatprep.subr.bf16.mxu1 %v1982_v54 }
 0x2a3   :  { %1605 = vmatpush3.bf16.msra.mxu1 %v1850_v50 }
 0x2a4   :  { %1606 = vmatprep.subr.bf16.mxu1 %v1982_v54 }
 0x2a7   :  { %1607 = vmatpush3.bf16.msra.mxu1 %v1851_v53 }
 0x2a8   :  { %1608 = vmatprep.subr.bf16.mxu1 %v1982_v54 }
 0x2ab   :  { %1609 = vmatpush3.bf16.msra.mxu1 %v1852_v6 }
 0x2ac   :  { %1610 = vmatprep.subr.bf16.mxu1 %v1982_v54 }
 0x2af   :  { %1611 = vmatpush3.bf16.msra.mxu1 %v1853_v7 }
 0x2b0   :  { %1612 = vmatprep.subr.bf16.mxu1 %v1982_v54 }
 0x2b3   :  { %1613 = vmatpush3.bf16.msra.mxu1 %v1854_v8 }
 0x369   :  { %v1583_v9 = vpop.f32.mrb[4].mxu1 }
 0x36a   :  { %v1584_v11 = vpop.f32.mrb[5].mxu1 }
 0x36b   :  { %v1585_v12 = vadd.f32 %v1584_v11, %v1583_v9  ;;  %v1586_v13 = vpop.f32.mrb[6].mxu1 }
 0x36c   :  { %v1587_v14 = vpop.f32.mrb[7].mxu1 }
 0x36d   :  { %v1263_v15 = vadd.f32 %v1585_v12, %v1539_v10 }
 0x36f   :  { %v1268_v16 = vmax.f32 %v1263_v15, 0.0 }
 0x371   :  { %v1269_v17 = vpack.c.bf16 %v1268_v16, %v1268_v16 }
 0x373   :  { %1615 = vmatmul.mubr.bf16.vlgmr.msra.gmra.mrb[8].mxu1 %v1269_v17 }
 0x446   :  { %v1375_v19 = vpop.f32.mrb[8].mxu1 }
 0x447   :  { %v1376_v20 = vadd.f32 %v1556_v18, %v1375_v19  ;;  %v1616_v21 = vpop.f32.mrb[9].mxu1 }
 0x448   :  { %v1378_v22 = vpop.f32.mrb[10].mxu1 }
 0x449   :  { %v1381_v24 = vmax.f32 %v1376_v20, 0.0  ;;  %v1617_v25 = vpop.f32.mrb[11].mxu1 }
 0x44b   :  { %v1389_v26 = vmul.f32 %v1565_v23, %v1381_v24 }
 0x44d   :  { %1390 = vadd.xlane.f32.xlu0 %v1389_v26 }
 0x4da   :  { %v1391_v28 = vpop.xlane.xlu0 %1390 }
 0x4db   :  { %v1399_v29 = vadd.f32 %v1566_v27, %v1391_v28 }
 0x4dd   :  { %1401 = vst.msk [vmem:[%s2175_s11] sm:$0xff] %vm1400_vm1, %v1399_v29 }
 0x4de   :  { %1406 = vsyncpa [#allocation4], 1 }
 0x4df   :  { %1407 = vsyncpa [#allocation6], 1 }
 0x4e0   :  { %1408 = vsyncpa [#allocation9], 1 }

</bundles_post_ra>
